<compile_context>
chip_gen: v5e
topology: v5e:2x2
jax: 0.10.0
libtpu: 0.0.40
codegen_flags: <defaults>
</compile_context>

<pallas_src>
import functools
import math

import jax
import jax.numpy as jnp
from jax import lax
from jax.experimental import pallas as pl
from jax.experimental.pallas import tpu as pltpu

LANE = 128
CAP_TILE_M = 512            # output-row tile cap for the aggregation kernel
CAP_TILE_K = 2048           # reduction tile cap (adj columns / support rows)
CAP_TILE_M_SUPPORT = 1024   # row tile cap for the standalone support matmul


def _round_up(v, m):
    return (v + m - 1) // m * m


def _vmem_limit_bytes():
    # ~half of physical VMEM: 64 MiB on v5e/v6e (128 MiB), 32 MiB on v7x (64 MiB).
    try:
        cap = getattr(pltpu.get_tpu_info(), "vmem_capacity_bytes", None)
        if cap:
            return int(min(max(cap // 2, 32 * 1024 * 1024), 64 * 1024 * 1024))
    except Exception:
        pass
    return 48 * 1024 * 1024


def _pick_k_tile(n_lane, cap=CAP_TILE_K):
    """Largest power-of-two multiple of LANE <= cap whose induced row padding
    over the lane-padded size stays <= n_lane/8 (bounds adj bandwidth waste)."""
    t = cap
    while t > LANE and (_round_up(n_lane, t) - n_lane) * 8 > n_lane:
        t //= 2
    return max(t, LANE)


def _divisor_tile(n_pad, cap):
    """Largest multiple of LANE that divides n_pad and is <= cap."""
    best = LANE
    t = LANE
    limit = min(cap, n_pad)
    while t <= limit:
        if n_pad % t == 0:
            best = t
        t += LANE
    return best


def _pick_row_tile(n_pad, cap=CAP_TILE_M):
    """Row tile: a divisor of n_pad, <= cap, preferring grid_i >= 2 (megacore)."""
    t = _divisor_tile(n_pad, cap)
    if t == n_pad and n_pad > LANE:
        t = _divisor_tile(n_pad, n_pad // 2)
    return t


# --------------------------- support = X @ W (split path) --------------------
def _support_kernel(x_ref, w_ref, out_ref):
    out_ref[...] = jnp.dot(
        x_ref[...], w_ref[...], preferred_element_type=jnp.float32
    ).astype(out_ref.dtype)


def _support_matmul(x, w):
    n_pad, f_pad = x.shape
    h_pad = w.shape[1]
    tile_m = _pick_row_tile(n_pad, CAP_TILE_M_SUPPORT)
    grid = (n_pad // tile_m,)
    flops = 2 * n_pad * f_pad * h_pad
    bytes_accessed = (x.size * x.dtype.itemsize + w.size * w.dtype.itemsize
                      + n_pad * h_pad * 2)
    return pl.pallas_call(
        _support_kernel,
        out_shape=jax.ShapeDtypeStruct((n_pad, h_pad), jnp.bfloat16),
        grid_spec=pltpu.PrefetchScalarGridSpec(
            num_scalar_prefetch=0,
            grid=grid,
            in_specs=[
                pl.BlockSpec((tile_m, f_pad), lambda i: (i, 0)),
                pl.BlockSpec((f_pad, h_pad), lambda i: (0, 0)),
            ],
            out_specs=pl.BlockSpec((tile_m, h_pad), lambda i: (i, 0)),
        ),
        compiler_params=pltpu.CompilerParams(
            dimension_semantics=("parallel",),
            vmem_limit_bytes=_vmem_limit_bytes(),
        ),
        cost_estimate=pl.CostEstimate(
            flops=flops, transcendentals=0, bytes_accessed=bytes_accessed),
    )(x, w)


# --------------------------- shared epilogue ---------------------------------
def _epilogue(acc, bias, final_layer, n_valid_cols, out_dtype):
    z = acc + bias  # bias add only once, in the epilogue
    if final_layer:
        # log_softmax over the class axis; padded class lanes masked to -inf.
        col = lax.broadcasted_iota(jnp.int32, z.shape, 1)
        z = jnp.where(col < n_valid_cols, z, -jnp.inf)
        m = jnp.max(z, axis=1, keepdims=True)
        s = z - m
        lse = jnp.log(jnp.sum(jnp.exp(s), axis=1, keepdims=True))
        return (s - lse).astype(out_dtype)
    return jnp.maximum(z, 0.0).astype(out_dtype)


# ------------------ out = epilogue(adj @ support + bias) ---------------------
def _aggregate_kernel(adj_ref, s_ref, b_ref, out_ref, acc_ref, *,
                      final_layer, n_valid_cols):
    k = pl.program_id(1)

    @pl.when(k == 0)
    def _():
        acc_ref[...] = jnp.zeros_like(acc_ref)

    acc_ref[...] += jnp.dot(adj_ref[...], s_ref[...],
                            preferred_element_type=jnp.float32)

    @pl.when(k == pl.num_programs(1) - 1)
    def _():
        out_ref[...] = _epilogue(acc_ref[...], b_ref[...], final_layer,
                                 n_valid_cols, out_ref.dtype)


# -------------- fused: out = epilogue(adj @ (x @ W) + bias) ------------------
def _fused_kernel(adj_ref, x_ref, w_ref, b_ref, out_ref, acc_ref, *,
                  final_layer, n_valid_cols):
    k = pl.program_id(1)

    @pl.when(k == 0)
    def _():
        acc_ref[...] = jnp.zeros_like(acc_ref)

    # support tile for this k slice; redundant recompute per row tile hides
    # under the adj HBM stream (kernel is bandwidth-bound on adj).
    s = jnp.dot(x_ref[...], w_ref[...],
                preferred_element_type=jnp.float32).astype(jnp.bfloat16)
    acc_ref[...] += jnp.dot(adj_ref[...], s,
                            preferred_element_type=jnp.float32)

    @pl.when(k == pl.num_programs(1) - 1)
    def _():
        out_ref[...] = _epilogue(acc_ref[...], b_ref[...], final_layer,
                                 n_valid_cols, out_ref.dtype)


# ------------------------------ one GCN layer --------------------------------
def _gcn_layer(adj, x, w, bias, *, tile_m, tile_k, final_layer, n_valid_cols,
               out_dtype):
    n_pad = adj.shape[0]
    f_pad = x.shape[1]
    h_pad = w.shape[1]
    grid = (n_pad // tile_m, n_pad // tile_k)

    fuse = f_pad <= h_pad  # per review: fuse X@W into aggregation when cheap
    if fuse:
        kernel = functools.partial(_fused_kernel, final_layer=final_layer,
                                   n_valid_cols=n_valid_cols)
        flops = (2 * n_pad * n_pad * h_pad
                 + grid[0] * 2 * n_pad * f_pad * h_pad)
        bytes_accessed = (adj.size * adj.dtype.itemsize
                          + grid[0] * x.size * x.dtype.itemsize
                          + w.size * w.dtype.itemsize
                          + n_pad * h_pad * jnp.dtype(out_dtype).itemsize)
        in_specs = [
            pl.BlockSpec((tile_m, tile_k), lambda i, k: (i, k)),
            pl.BlockSpec((tile_k, f_pad), lambda i, k: (k, 0)),
            pl.BlockSpec((f_pad, h_pad), lambda i, k: (0, 0)),
            pl.BlockSpec((1, h_pad), lambda i, k: (0, 0)),
        ]
        operands = (adj, x, w, bias)
    else:
        support = _support_matmul(x, w)
        kernel = functools.partial(_aggregate_kernel, final_layer=final_layer,
                                   n_valid_cols=n_valid_cols)
        flops = 2 * n_pad * n_pad * h_pad
        bytes_accessed = (adj.size * adj.dtype.itemsize
                          + grid[0] * support.size * support.dtype.itemsize
                          + n_pad * h_pad * jnp.dtype(out_dtype).itemsize)
        in_specs = [
            pl.BlockSpec((tile_m, tile_k), lambda i, k: (i, k)),
            pl.BlockSpec((tile_k, h_pad), lambda i, k: (k, 0)),
            pl.BlockSpec((1, h_pad), lambda i, k: (0, 0)),
        ]
        operands = (adj, support, bias)

    return pl.pallas_call(
        kernel,
        out_shape=jax.ShapeDtypeStruct((n_pad, h_pad), out_dtype),
        grid_spec=pltpu.PrefetchScalarGridSpec(
            num_scalar_prefetch=0,
            grid=grid,
            in_specs=in_specs,
            out_specs=pl.BlockSpec((tile_m, h_pad), lambda i, k: (i, 0)),
            scratch_shapes=[pltpu.VMEM((tile_m, h_pad), jnp.float32)],
        ),
        compiler_params=pltpu.CompilerParams(
            dimension_semantics=("parallel", "arbitrary"),
            vmem_limit_bytes=_vmem_limit_bytes(),
        ),
        cost_estimate=pl.CostEstimate(
            flops=flops,
            transcendentals=n_pad * h_pad if final_layer else 0,
            bytes_accessed=bytes_accessed),
    )(*operands)


# ------------------------------ forward --------------------------------------
def strg_forward(x, adj, w1, b1, w2, b2):
    n, nfeat = x.shape
    nhid = w1.shape[1]
    nclass = w2.shape[1]

    # Row padding decoupled from tile size (lane-pad first, then only as much
    # extra as the chosen reduction tile requires, bounded at N/8).
    n_lane = _round_up(max(n, 1), LANE)
    tile_k = _pick_k_tile(n_lane)
    n_pad = _round_up(n_lane, tile_k)
    tile_m = _pick_row_tile(n_pad, CAP_TILE_M)

    f_pad = _round_up(nfeat, LANE)
    h_pad = _round_up(nhid, LANE)
    c_pad = _round_up(nclass, LANE)

    def pad2(a, rows, cols, dtype):
        a = a.astype(dtype)
        return jnp.pad(a, ((0, rows - a.shape[0]), (0, cols - a.shape[1])))

    # bf16 matmul operands, f32 biases (accumulation stays f32 in-kernel).
    x_p = pad2(x, n_pad, f_pad, jnp.bfloat16)
    adj_p = pad2(adj, n_pad, n_pad, jnp.bfloat16)
    w1_p = pad2(w1, f_pad, h_pad, jnp.bfloat16)
    w2_p = pad2(w2, h_pad, c_pad, jnp.bfloat16)
    b1_p = pad2(b1.reshape(1, -1), 1, h_pad, jnp.float32)
    b2_p = pad2(b2.reshape(1, -1), 1, c_pad, jnp.float32)

    # Layer 1: h = relu(adj @ (x @ W1) + b1)
    h = _gcn_layer(adj_p, x_p, w1_p, b1_p, tile_m=tile_m, tile_k=tile_k,
                   final_layer=False, n_valid_cols=nhid,
                   out_dtype=jnp.bfloat16)

    # Dropout: identity in eval mode (training=False).
    # TODO(synk): training-mode dropout (stateful PRNG mask) not implemented.

    # Layer 2: log_softmax(adj @ (h @ W2) + b2, axis=1)
    logp = _gcn_layer(adj_p, h, w2_p, b2_p, tile_m=tile_m, tile_k=tile_k,
                      final_layer=True, n_valid_cols=nclass,
                      out_dtype=jnp.float32)

    return logp[:n, :nclass]


def init_gcn_params(key, in_features, out_features):
    # Matches GraphConvolution.reset_parameters: U(-stdv, stdv), stdv = 1/sqrt(out)
    stdv = 1.0 / math.sqrt(out_features)
    kw, kb = jax.random.split(key)
    w = jax.random.uniform(kw, (in_features, out_features), jnp.float32, -stdv, stdv)
    b = jax.random.uniform(kb, (1, out_features), jnp.float32, -stdv, stdv)
    return w, b


def _reference(x, adj, w1, b1, w2, b2):
    h = jnp.maximum(adj @ (x @ w1) + b1, 0.0)
    z = adj @ (h @ w2) + b2
    return jax.nn.log_softmax(z, axis=1)


def _reference_bf16(x, adj, w1, b1, w2, b2):
    # Emulates the kernel's bf16-operand / f32-accumulate numerics.
    bf = lambda a: a.astype(jnp.bfloat16).astype(jnp.float32)
    s1 = bf(x) @ bf(w1)
    h = jnp.maximum(bf(adj) @ bf(s1) + b1, 0.0)
    s2 = bf(h) @ bf(w2)
    z = bf(adj) @ bf(s2) + b2
    return jax.nn.log_softmax(z, axis=1)


if __name__ == "__main__":
    key = jax.random.PRNGKey(0)
    k_x, k_adj, k_g1, k_g2 = jax.random.split(key, 4)

    # Small synthetic graph. nfeat > 128 so layer 1 exercises the split
    # (support + aggregate) path; nhid <= 128 so layer 2 uses the fused path.
    # N=300 gives a multi-tile (3x3) aggregation grid.
    N, nfeat, nhid, nclass = 300, 200, 64, 7

    x = jax.random.normal(k_x, (N, nfeat), jnp.float32)

    # Symmetric normalized adjacency (dense), like utils.normalize_adj_tensor.
    a = (jax.random.uniform(k_adj, (N, N)) < 0.05).astype(jnp.float32)
    a = jnp.maximum(a, a.T) + jnp.eye(N, dtype=jnp.float32)
    d_inv_sqrt = 1.0 / jnp.sqrt(a.sum(axis=1))
    adj = d_inv_sqrt[:, None] * a * d_inv_sqrt[None, :]

    w1, b1 = init_gcn_params(k_g1, nfeat, nhid)
    w2, b2 = init_gcn_params(k_g2, nhid, nclass)

    out = strg_forward(x, adj, w1, b1, w2, b2)
    out = jax.block_until_ready(out)
    assert out.shape == (N, nclass)

    with jax.default_matmul_precision("highest"):
        ref = _reference(x, adj, w1, b1, w2, b2)
        ref_bf = _reference_bf16(x, adj, w1, b1, w2, b2)

    # Tight check vs a reference that emulates the kernel's bf16 operands,
    # loose check vs the pure-f32 reference (bf16 quantization error).
    assert jnp.allclose(out, ref_bf, atol=1e-2, rtol=1e-2), "mismatch vs bf16 reference"
    assert jnp.allclose(out, ref, atol=6e-2, rtol=6e-2), "mismatch vs f32 reference"

    print("KERNEL_OK")
</pallas_src>

<mosaic_0001>
module attributes {stable_mosaic.version = 11 : i64} {
  func.func @_support_kernel(%arg0: i32, %arg1: memref<128x256xbf16, #tpu.memory_space<vmem>>, %arg2: memref<256x128xbf16, #tpu.memory_space<vmem>>, %arg3: memref<128x128xbf16, #tpu.memory_space<vmem>>) attributes {dimension_semantics = [#tpu.dimension_semantics<parallel>], iteration_bounds = array<i64: 3>, scalar_prefetch = 0 : i64, scratch_operands = 0 : i64, tpu.core_type = #tpu.core_type<tc>, window_params = [{transform_indices = @transform_0, window_bounds = array<i64: 128, 256>}, {pipeline_mode = #tpu.pipeline_mode<synchronous>, transform_indices = @transform_1, window_bounds = array<i64: 256, 128>}, {transform_indices = @transform_2, window_bounds = array<i64: 128, 128>}]} {
    %c0 = arith.constant 0 : index
    %c0_0 = arith.constant 0 : index
    %0 = vector.load %arg1[%c0, %c0_0] : memref<128x256xbf16, #tpu.memory_space<vmem>>, vector<128x256xbf16>
    %c0_1 = arith.constant 0 : index
    %c0_2 = arith.constant 0 : index
    %1 = vector.load %arg2[%c0_1, %c0_2] : memref<256x128xbf16, #tpu.memory_space<vmem>>, vector<256x128xbf16>
    %cst = arith.constant dense<0.000000e+00> : vector<128x128xf32>
    %2 = tpu.matmul %0, %1, %cst {dimension_numbers = #tpu.dot_dimension_numbers<[1], [0], [0], [1], [0, 0, 1, 1], [], []>} : vector<128x256xbf16>, vector<256x128xbf16>, vector<128x128xf32> -> vector<128x128xf32>
    %3 = arith.truncf %2 : vector<128x128xf32> to vector<128x128xbf16>
    %c0_3 = arith.constant 0 : index
    %c0_4 = arith.constant 0 : index
    %4 = vector.load %arg3[%c0_3, %c0_4] : memref<128x128xbf16, #tpu.memory_space<vmem>>, vector<128x128xbf16>
    tpu.vector_store %arg3[%c0_3, %c0_4], %3 {strides = array<i32>} : memref<128x128xbf16, #tpu.memory_space<vmem>>, vector<128x128xbf16>,
    return
  }
  func.func @transform_0(%arg0: i32) -> (i32, i32) {
    %c0_i32 = arith.constant 0 : i32
    %c0_i32_0 = arith.constant 0 : i32
    return %arg0, %c0_i32 : i32, i32
  }
  func.func @transform_1(%arg0: i32) -> (i32, i32) {
    %c0_i32 = arith.constant 0 : i32
    %c0_i32_0 = arith.constant 0 : i32
    %c0_i32_1 = arith.constant 0 : i32
    return %c0_i32, %c0_i32_0 : i32, i32
  }
  func.func @transform_2(%arg0: i32) -> (i32, i32) {
    %c0_i32 = arith.constant 0 : i32
    %c0_i32_0 = arith.constant 0 : i32
    return %arg0, %c0_i32 : i32, i32
  }
}

</mosaic_0001>

<bundles_post_ra>
// kernel: tpu_custom_call.1
= control target key start
LH: loop header
LB: loop body
LE: loop exit
PB: predicated region body
PF: predicated region fallthrough
CT: control target
= control target key end

     0   :  { %7 = vsyncpa [#allocation3], 0  ;;  %s1281_s0 = inlined_call_operand.hbm [shape: bf16[384,256], index: 0, kind: input, shape index: {}]   ;;  %s1282_s1 = inlined_call_operand.hbm [shape: bf16[256,128], index: 1, kind: input, shape index: {}]   ;;  %s1283_s2 = inlined_call_operand.hbm [shape: bf16[384,128], index: 2, kind: output, shape index: {}]  }
   0x1   :  { %9 = vsyncpa [#allocation3 + $0x1], 0 }
   0x2   :  { %10 = vsyncpa [#allocation6], 0 }
   0x3   :  { %11 = vsyncpa [#allocation4], 0 }
   0x4   :  { %13 = vsyncpa [#allocation4 + $0x1], 0  ;;  %s1097_s9 = smov 0   ;;  %s1099_s10 = smov 0  }
   0x5   :  { %s1101_s11 = smov 0   ;;  %s1103_s12 = smov 0  }
   0x6 LB: > { %s1118_s13 = sadd.s32 4294967295, %s1073_s12   ;;  %s637_s14 = sadd.s32 4294967294, %s1073_s12   ;;  %s1073_s12 = sphi %s1103_s12, %s1292_s12   ;;  %s1069_s11 = sphi %s1101_s11, %s1291_s11   ;;  %s1065_s10 = sphi %s1099_s10, %s1290_s10   ;;  %s1061_s9 = sphi %s1097_s9, %s1289_s9  }
   0x7   : > { %p39_p0 = scmp.ne.s32.totalorder %s1065_s10, %s1061_s9  ;;  %p40_p1 = scmp.eq.s32.totalorder %s1118_s13, 0 }
   0x8   : > { %p84_p2 = scmp.eq.s32.totalorder %s1118_s13, 2  ;;  %p90_p3 = scmp.eq.s32.totalorder %s637_s14, 2 }
   0x9   : > { %p1127_p4 = por %p40_p1, %p39_p0  ;;  %p638_p5 = scmp.ge.s32.totalorder %s1073_s12, 1 }
   0xa   : > { %p1132_p6 = por %p90_p3, %p39_p0  ;;  %p97_p7 = scmp.lt.s32.totalorder %s1073_s12, 4 }
   0xb   : > { %s108_s19 = sshll.u32 %s1282_s1, 4  ;;  %s1075_s21 = smov [#allocation5]   ;;  %s109_s19 = int_to_ptr.hbm [resolvable:$true] %s108_s19 }
   0xc   : > { %p1140_p8 = pnand %p638_p5, %p97_p7  ;;  %s110_s22 = sshll.u32 %s1075_s21, 4  ;;  %s111_s22 = int_to_ptr.vmem [resolvable:$true] %s110_s22 }
   0xd   : > { %s1149_s23 = sadd.s32 1, %s1073_s12   ;;  %s1076_s24 = smov 64  }
   0xe   : > { %p888_p9 = pneg %p1140_p8  ;;  %s1077_s25 = smov 4  }
   0xf   : > { %s23_s26 = ssub.s32 %s1073_s12, %s1149_s23  ;;  %s26_s27 = sadd.s32 1, %s1069_s11 }
  0x10   : > { %p889_p10 = pnand %p888_p9, %p40_p1  ;;  %p24_p11 = scmp.eq.s32.totalorder %s23_s26, 0 }
  0x11   : > { %p33_p12 = scmp.ne.s32.totalorder %s1069_s11, %s1065_s10  ;;  %p34_p13 = scmp.eq.s32.totalorder %s1073_s12, 0 }
  0x12   : > { %891 = dma.hbm_to_vmem [thread:$0]  (!%p889_p10), %s109_s19, 2048, %s111_s22, [#allocation6], %s1076_s24, %s1076_s24, %s1077_s25  }
  0x13   : > { %p901_p0 = scmp.lt.s32.totalorder %s1073_s12, 3  ;;  %p35_p3 = por %p34_p13, %p33_p12 }
  0x14   : > { %s1159_s28 = scalar_select %p24_p11, %s1069_s11, %s26_s27  }
  0x15   : > { %p1163_p5 = por %p84_p2, %p33_p12  ;;  %s124_s30 = sand.u32 1, %s1069_s11  }
  0x16   : > { %s783_s3 = sshll.u32 %s1073_s12, 7  ;;  %s641_s4 = sshll.u32 %s124_s30, 7 }
  0x17   : > { %s134_s7 = scalar_lea.hbm %s1281_s0, %s783_s3  ;;  %s128_s14 = scalar_lea.vmem [#allocation2], %s641_s4 }
  0x18   : > { %s135_s8 = sshll.u32 %s134_s7, 4  ;;  %s137_s17 = sshll.u32 %s128_s14, 4  ;;  %s136_s8 = int_to_ptr.hbm [resolvable:$true] %s135_s8  ;;  %s138_s17 = int_to_ptr.vmem [resolvable:$true] %s137_s17 }
  0x19   : > { %p1174_p7 = pnand %p901_p0, %p35_p3  ;;  %s125_s19 = scalar_lea.sflag [#allocation3], %s124_s30 }
  0x1a   : > { %s973_s21 = sshra.s32 %s136_s8, 4  ;;  %s980_s26 = scalar_lea.hbm %s1281_s0, 384  ;;  %s974_s21 = int_to_ptr.hbm [resolvable:$true] %s973_s21 }
  0x1b   : > { %s975_s22 = scalar_lea.hbm %s974_s21, 128  ;;  %p977_p9 = pneg %p1174_p7 }
  0x1c   : > { %p976_p2 = scmp.ne.s32.totalorder %s974_s21, %s975_s22  ;;  %p981_p12 = scmp.lt.s32.totalorder %s974_s21, %s1281_s0 }
  0x1d   : > { %p982_p13 = scmp.lt.s32.totalorder %s980_s26, %s975_s22 }
  0x1e   : > { %p978_p10 = pnand %p977_p9, %p976_p2 }
  0x1f   : > { %p983_p0 = por %p982_p13, %p981_p12 }
  0x20   : > { %p979_p11 = pneg %p978_p10 }
  0x22   : > { %p984_p3 = pnand %p983_p0, %p979_p11 }
  0x24   : > { %987 = shalt.err (!%p984_p3)
}
  0x25   : > { %s1078_s30 = smov 128   ;;  %s1079_s4 = smov 8  }
  0x26   : > { %895 = dma.hbm_to_vmem [thread:$0]  (!%p1174_p7), %s136_s8, 2048, %s138_s17, %s125_s19, %s1078_s30, %s1078_s30, %s1079_s4  }
  0x27   : > { %149 = sbr.rel (%p1140_p8) target bundleno = 276 (0x114), region = 28  ;;  %s1191_s5 = sand.u32 (!%p1140_p8), 1, %s1065_s10  }
  0x28   : > { %s646_s6 = sshll.u32 (!%p1140_p8), %s1191_s5, 7  ;;  %s152_s7 = scalar_lea.sflag (!%p1140_p8), [#allocation3], %s1191_s5 }
  0x29   : > { %s1195_s14 = scalar_lea.vmem (!%p1140_p8), [#allocation2], %s646_s6 }
  0x2c   : > { %1048 = dma.done.wait (%p1127_p4), %s152_s7, 2048  }
  0x2d   : > { %1050 = vsyncadd (%p1127_p4), %s152_s7, 4294965248 }
  0x2e   : > { %1052 = dma.done.wait (%p40_p1), [#allocation6], 2048  }
  0x2f   : > { %1054 = vsyncadd (%p40_p1), [#allocation6], 4294965248  ;;  %v807_v0 = vld [vmem:[#allocation5 + $0x38] sm:$0xff]  ;;  %v806_v2 = vld [vmem:[#allocation5 + $0x30] sm:$0xff]  ;;  %s648_s15 = sshll.u32 %s1191_s5, 6  ;;  %s816_s8 = sshll.u32 %s1118_s13, 6 }
  0x30   : > { %v815_v1 = vld [vmem:[#allocation5 + $0x78] sm:$0xff]  ;;  %408 = vmatpush.bf16.msra.mxu0 %v807_v0  ;;  %864 = vmatpush.bf16.msra.mxu2 %v807_v0  ;;  %v814_v3 = vld [vmem:[#allocation5 + $0x70] sm:$0xff]  ;;  %v805_v4 = vld [vmem:[#allocation5 + $0x28] sm:$0xff]  ;;  %s1238_s20 = scalar_lea.vmem [#allocation7], %s648_s15  ;;  %s550_s19 = scalar_lea.hbm %s1283_s2, %s816_s8 }
  0x31   : > { %457 = vmatpush.bf16.msra.mxu1 %v815_v1  ;;  %872 = vmatpush.bf16.msra.mxu3 %v815_v1  ;;  %v813_v5 = vld [vmem:[#allocation5 + $0x68] sm:$0xff]  ;;  %v804_v6 = vld [vmem:[#allocation5 + $0x20] sm:$0xff]  ;;  %v803_v8 = vld [vmem:[#allocation5 + $0x18] sm:$0xff]  ;;  %s551_s21 = sshll.u32 %s1238_s20, 4  ;;  %s553_s22 = sshll.u32 %s550_s19, 4  ;;  %s552_s21 = int_to_ptr.vmem [resolvable:$true] %s551_s21  ;;  %s554_s22 = int_to_ptr.hbm [resolvable:$true] %s553_s22 }
  0x32   : > { %v812_v7 = vld [vmem:[#allocation5 + $0x60] sm:$0xff]  ;;  %v811_v9 = vld [vmem:[#allocation5 + $0x58] sm:$0xff]  ;;  %v802_v10 = vld [vmem:[#allocation5 + $0x10] sm:$0xff]  ;;  %s539_s13 = scalar_lea.sflag [#allocation4], %s1191_s5  ;;  %s1017_s24 = sshra.s32 %s554_s22, 4  ;;  %s1018_s24 = int_to_ptr.hbm [resolvable:$true] %s1017_s24 }
  0x33   : > { %v810_v11 = vld [vmem:[#allocation5 + $0x50] sm:$0xff]  ;;  %v801_v12 = vld [vmem:[#allocation5 + $0x8] sm:$0xff]  ;;  %v800_v14 = vld [vmem:[#allocation5] sm:$0xff]  ;;  %s1019_s25 = scalar_lea.hbm %s1018_s24, 64  ;;  %s1023_s3 = scalar_lea.hbm %s1283_s2, 192 }
  0x34   : > { %409 = vmatpush.bf16.msra.mxu0 %v806_v2  ;;  %865 = vmatpush.bf16.msra.mxu2 %v806_v2  ;;  %v809_v13 = vld [vmem:[#allocation5 + $0x48] sm:$0xff]  ;;  %v808_v15 = vld [vmem:[#allocation5 + $0x40] sm:$0xff]  ;;  %v659_v28 = vld [vmem:[%s1195_s14 + $0x10] sm:$0xf]  ;;  %p1020_p1 = scmp.ne.s32.totalorder %s1018_s24, %s1019_s25  ;;  %p1024_p7 = scmp.lt.s32.totalorder %s1018_s24, %s1283_s2 }
  0x35   : > { %458 = vmatpush.bf16.msra.mxu1 %v814_v3  ;;  %873 = vmatpush.bf16.msra.mxu3 %v814_v3  ;;  %v651_v16 = vld [vmem:[%s1195_s14] sm:$0xf]  ;;  %v785_v17 = vld [vmem:[%s1195_s14 + $0x4] sm:$0xf0]  ;;  %v784_v20 = vld [vmem:[%s1195_s14 + $0x4] sm:$0xf]  ;;  %p1025_p2 = scmp.lt.s32.totalorder %s1023_s3, %s1019_s25 }
  0x36   : > { %v683_v18 = vld [vmem:[%s1195_s14 + $0x40] sm:$0xf]  ;;  %v793_v19 = vld [vmem:[%s1195_s14 + $0x44] sm:$0xf0]  ;;  %v653_v21 = vld [vmem:[%s1195_s14 + $0x8] sm:$0xf0]  ;;  %v652_v24 = vor.u32 %v785_v17, %v651_v16  ;;  %p1021_p4 = pnand %p1020_p1, %p1163_p5 }
  0x37   : > { %v792_v22 = vld [vmem:[%s1195_s14 + $0x44] sm:$0xf]  ;;  %v685_v23 = vld [vmem:[%s1195_s14 + $0x48] sm:$0xf0]  ;;  %v684_v25 = vor.u32 %v793_v19, %v683_v18  ;;  %v656_v26 = vor.u32 %v784_v20, %v653_v21  ;;  %v787_v29 = vld [vmem:[%s1195_s14 + $0x14] sm:$0xf0]  ;;  %p1026_p9 = por %p1025_p2, %p1024_p7 }
  0x38   : > { %410 = vmatpush.bf16.msra.mxu0 %v805_v4  ;;  %866 = vmatpush.bf16.msra.mxu2 %v805_v4  ;;  %v688_v27 = vor.u32 %v792_v22, %v685_v23  ;;  %v691_v30 = vld [vmem:[%s1195_s14 + $0x50] sm:$0xf]  ;;  %v795_v31 = vld [vmem:[%s1195_s14 + $0x54] sm:$0xf0]  ;;  %v786_v32 = vld [vmem:[%s1195_s14 + $0x14] sm:$0xf]  ;;  %v660_v36 = vor.u32 %v787_v29, %v659_v28  ;;  %p1022_p8 = pneg %p1021_p4 }
  0x39   : > { %459 = vmatpush.bf16.msra.mxu1 %v813_v5  ;;  %874 = vmatpush.bf16.msra.mxu3 %v813_v5  ;;  %v661_v33 = vld [vmem:[%s1195_s14 + $0x18] sm:$0xf0]  ;;  %v794_v34 = vld [vmem:[%s1195_s14 + $0x54] sm:$0xf]  ;;  %v692_v37 = vor.u32 %v795_v31, %v691_v30  ;;  %v667_v40 = vld [vmem:[%s1195_s14 + $0x20] sm:$0xf] }
  0x3a   : > { %v693_v35 = vld [vmem:[%s1195_s14 + $0x58] sm:$0xf0]  ;;  %v664_v38 = vor.u32 %v786_v32, %v661_v33  ;;  %v789_v41 = vld [vmem:[%s1195_s14 + $0x24] sm:$0xf0]  ;;  %v699_v42 = vld [vmem:[%s1195_s14 + $0x60] sm:$0xf]  ;;  %p1027_p10 = pnand %p1026_p9, %p1022_p8 }
  0x3b   : > { %v696_v39 = vor.u32 %v794_v34, %v693_v35  ;;  %v797_v43 = vld [vmem:[%s1195_s14 + $0x64] sm:$0xf0]  ;;  %v788_v44 = vld [vmem:[%s1195_s14 + $0x24] sm:$0xf]  ;;  %v669_v45 = vld [vmem:[%s1195_s14 + $0x28] sm:$0xf0]  ;;  %v668_v48 = vor.u32 %v789_v41, %v667_v40 }
  0x3c   : > { %411 = vmatpush.bf16.msra.mxu0 %v804_v6  ;;  %867 = vmatpush.bf16.msra.mxu2 %v804_v6  ;;  %v796_v46 = vld [vmem:[%s1195_s14 + $0x64] sm:$0xf]  ;;  %v701_v47 = vld [vmem:[%s1195_s14 + $0x68] sm:$0xf0]  ;;  %v700_v49 = vor.u32 %v797_v43, %v699_v42  ;;  %v672_v50 = vor.u32 %v788_v44, %v669_v45  ;;  %v675_v52 = vld [vmem:[%s1195_s14 + $0x30] sm:$0xf] }
  0x3d   : > { %460 = vmatpush.bf16.msra.mxu1 %v812_v7  ;;  %875 = vmatpush.bf16.msra.mxu3 %v812_v7  ;;  %v704_v51 = vor.u32 %v796_v46, %v701_v47  ;;  %v791_v53 = vld [vmem:[%s1195_s14 + $0x34] sm:$0xf0]  ;;  %v707_v54 = vld [vmem:[%s1195_s14 + $0x70] sm:$0xf]  ;;  %v790_v56 = vld [vmem:[%s1195_s14 + $0x34] sm:$0xf] }
  0x3e   : > { %v799_v55 = vld [vmem:[%s1195_s14 + $0x74] sm:$0xf0]  ;;  %v677_v57 = vld [vmem:[%s1195_s14 + $0x38] sm:$0xf0]  ;;  %v798_v58 = vld [vmem:[%s1195_s14 + $0x74] sm:$0xf]  ;;  %v676_v60 = vor.u32 %v791_v53, %v675_v52 }
  0x3f   : > { %v709_v59 = vld [vmem:[%s1195_s14 + $0x78] sm:$0xf0]  ;;  %v708_v61 = vor.u32 %v799_v55, %v707_v54  ;;  %v680_v62 = vor.u32 %v790_v56, %v677_v57 }
  0x40   : > { %412 = vmatpush.bf16.msra.mxu0 %v803_v8  ;;  %868 = vmatpush.bf16.msra.mxu2 %v803_v8  ;;  %v712_v63 = vor.u32 %v798_v58, %v709_v59 }
  0x41   : > { %461 = vmatpush.bf16.msra.mxu1 %v811_v9  ;;  %876 = vmatpush.bf16.msra.mxu3 %v811_v9 }
  0x44   : > { %413 = vmatpush.bf16.msra.mxu0 %v802_v10  ;;  %869 = vmatpush.bf16.msra.mxu2 %v802_v10 }
  0x45   : > { %462 = vmatpush.bf16.msra.mxu1 %v810_v11  ;;  %877 = vmatpush.bf16.msra.mxu3 %v810_v11 }
  0x48   : > { %414 = vmatpush.bf16.msra.mxu0 %v801_v12  ;;  %870 = vmatpush.bf16.msra.mxu2 %v801_v12 }
  0x49   : > { %463 = vmatpush.bf16.msra.mxu1 %v809_v13  ;;  %878 = vmatpush.bf16.msra.mxu3 %v809_v13 }
  0x4c   : > { %415 = vmatpush.bf16.msra.mxu0 %v800_v14  ;;  %871 = vmatpush.bf16.msra.mxu2 %v800_v14 }
  0x4d   : > { %464 = vmatpush.bf16.msra.mxu1 %v808_v15  ;;  %879 = vmatpush.bf16.msra.mxu3 %v808_v15 }
  0x4f   : > { %416 = vmatmul.bf16.vlgmr.msra.gmra.mxu0 %v652_v24  ;;  %436 = vmatmul.bf16.vlgmr.msra.gmra.mxu2 %v684_v25 }
  0x50   : > { %465 = vmatmul.bf16.vlgmr.msra.gmra.mxu1 %v656_v26  ;;  %485 = vmatmul.bf16.vlgmr.msra.gmra.mxu3 %v688_v27 }
  0x5f   : > { %421 = vmatmul.bf16.gmra.mxu0 %v660_v36  ;;  %441 = vmatmul.bf16.gmra.mxu2 %v692_v37 }
  0x60   : > { %470 = vmatmul.bf16.gmra.mxu1 %v664_v38  ;;  %490 = vmatmul.bf16.gmra.mxu3 %v696_v39 }
  0x6f   : > { %426 = vmatmul.bf16.gmra.mxu0 %v668_v48  ;;  %446 = vmatmul.bf16.gmra.mxu2 %v700_v49 }
  0x70   : > { %475 = vmatmul.bf16.gmra.mxu1 %v672_v50  ;;  %495 = vmatmul.bf16.gmra.mxu3 %v704_v51 }
  0x7f   : > { %431 = vmatmul.bf16.gmra.mxu0 %v676_v60  ;;  %451 = vmatmul.bf16.gmra.mxu2 %v708_v61 }
  0x80   : > { %480 = vmatmul.bf16.gmra.mxu1 %v680_v62  ;;  %500 = vmatmul.bf16.gmra.mxu3 %v712_v63 }
  0xcc   : > { %v417_v0 = vpop.f32.mrf.mxu0 }
  0xcd   : > { %v466_v1 = vpop.f32.mrf.mxu1 }
  0xce   : > { %v467_v6 = vadd.f32 %v466_v1, %v417_v0 }
  0xd2   : > { %v437_v2 = vpop.f32.mrf.mxu2 }
  0xd3   : > { %v486_v3 = vpop.f32.mrf.mxu3 }
  0xd4   : > { %v419_v4 = vpop.f32.mrf.mxu0  ;;  %v487_v11 = vadd.f32 %v486_v3, %v437_v2 }
  0xd5   : > { %v468_v5 = vpop.f32.mrf.mxu1 }
  0xd6   : > { %v469_v7 = vadd.f32 %v468_v5, %v419_v4 }
  0xd8   : > { %v820_v8 = vpack.c.bf16 %v469_v7, %v467_v6 }
  0xda   : > { %821 = vst [vmem:[%s1238_s20] sm:$0xff] %v820_v8   ;;  %v439_v9 = vpop.f32.mrf.mxu2 }
  0xdb   : > { %v488_v10 = vpop.f32.mrf.mxu3 }
  0xdc   : > { %v489_v12 = vadd.f32 %v488_v10, %v439_v9  ;;  %v422_v13 = vpop.f32.mrf.mxu0 }
  0xdd   : > { %v471_v14 = vpop.f32.mrf.mxu1 }
  0xde   : > { %v840_v15 = vpack.c.bf16 %v489_v12, %v487_v11  ;;  %v472_v20 = vadd.f32 %v471_v14, %v422_v13 }
  0xe0   : > { %860 = vst [vmem:[%s1238_s20 + $0x20] sm:$0xff] %v840_v15  }
  0xe2   : > { %v442_v16 = vpop.f32.mrf.mxu2 }
  0xe3   : > { %v491_v17 = vpop.f32.mrf.mxu3 }
  0xe4   : > { %v424_v18 = vpop.f32.mrf.mxu0  ;;  %v492_v25 = vadd.f32 %v491_v17, %v442_v16 }
  0xe5   : > { %v473_v19 = vpop.f32.mrf.mxu1 }
  0xe6   : > { %v474_v21 = vadd.f32 %v473_v19, %v424_v18 }
  0xe8   : > { %v825_v22 = vpack.c.bf16 %v474_v21, %v472_v20 }
  0xea   : > { %857 = vst [vmem:[%s1238_s20 + $0x8] sm:$0xff] %v825_v22   ;;  %v444_v23 = vpop.f32.mrf.mxu2 }
  0xeb   : > { %v493_v24 = vpop.f32.mrf.mxu3 }
  0xec   : > { %v494_v26 = vadd.f32 %v493_v24, %v444_v23  ;;  %v427_v27 = vpop.f32.mrf.mxu0 }
  0xed   : > { %v476_v28 = vpop.f32.mrf.mxu1 }
  0xee   : > { %v845_v29 = vpack.c.bf16 %v494_v26, %v492_v25  ;;  %v477_v34 = vadd.f32 %v476_v28, %v427_v27 }
  0xf0   : > { %861 = vst [vmem:[%s1238_s20 + $0x28] sm:$0xff] %v845_v29  }
  0xf2   : > { %v447_v30 = vpop.f32.mrf.mxu2 }
  0xf3   : > { %v496_v31 = vpop.f32.mrf.mxu3 }
  0xf4   : > { %v429_v32 = vpop.f32.mrf.mxu0  ;;  %v497_v39 = vadd.f32 %v496_v31, %v447_v30 }
  0xf5   : > { %v478_v33 = vpop.f32.mrf.mxu1 }
  0xf6   : > { %v479_v35 = vadd.f32 %v478_v33, %v429_v32 }
  0xf8   : > { %v830_v36 = vpack.c.bf16 %v479_v35, %v477_v34 }
  0xfa   : > { %858 = vst [vmem:[%s1238_s20 + $0x10] sm:$0xff] %v830_v36   ;;  %v449_v37 = vpop.f32.mrf.mxu2 }
  0xfb   : > { %v498_v38 = vpop.f32.mrf.mxu3 }
  0xfc   : > { %v499_v40 = vadd.f32 %v498_v38, %v449_v37  ;;  %v432_v41 = vpop.f32.mrf.mxu0 }
  0xfd   : > { %v481_v42 = vpop.f32.mrf.mxu1 }
  0xfe   : > { %v850_v43 = vpack.c.bf16 %v499_v40, %v497_v39  ;;  %v482_v48 = vadd.f32 %v481_v42, %v432_v41 }
 0x100   : > { %862 = vst [vmem:[%s1238_s20 + $0x30] sm:$0xff] %v850_v43  }
 0x102   : > { %v452_v44 = vpop.f32.mrf.mxu2 }
 0x103   : > { %v501_v45 = vpop.f32.mrf.mxu3 }
 0x104   : > { %v434_v46 = vpop.f32.mrf.mxu0  ;;  %v502_v53 = vadd.f32 %v501_v45, %v452_v44 }
 0x105   : > { %v483_v47 = vpop.f32.mrf.mxu1 }
 0x106   : > { %v484_v49 = vadd.f32 %v483_v47, %v434_v46 }
 0x108   : > { %v835_v50 = vpack.c.bf16 %v484_v49, %v482_v48 }
 0x10a   : > { %859 = vst [vmem:[%s1238_s20 + $0x18] sm:$0xff] %v835_v50   ;;  %v454_v51 = vpop.f32.mrf.mxu2 }
 0x10b   : > { %v503_v52 = vpop.f32.mrf.mxu3 }
 0x10c   : > { %v504_v54 = vadd.f32 %v503_v52, %v454_v51 }
 0x10e   : > { %v855_v55 = vpack.c.bf16 %v504_v54, %v502_v53 }
 0x110   : > { %863 = vst [vmem:[%s1238_s20 + $0x38] sm:$0xff] %v855_v55  }
 0x111   : > { %1030 = shalt.err (!%p1027_p10)
}
 0x112   : > { %s1080_s5 = smov 64   ;;  %s1081_s6 = smov 4  }
 0x113   : > { %886 = dma.vmem_to_hbm [thread:$0]  (%p1163_p5), %s552_s21, 1024, %s554_s22, %s539_s13, %s1080_s5, %s1080_s5, %s1081_s6  }
 0x114 PF: > { %p903_p11 = scmp.ge.s32.totalorder %s1073_s12, 2  ;;  %s568_s7 = sand.u32 1, %s1061_s9  }
 0x115   : > { %s569_s14 = scalar_lea.sflag [#allocation4], %s568_s7 }
 0x116   : > { %p897_p12 = pnand %p903_p11, %p1132_p6 }
 0x118   : > { %p898_p13 = pneg %p897_p12 }
 0x11a   : > { %1056 = dma.done.wait (%p898_p13), %s569_s14, 1024  }
 0x11b   : > { %1058 = vsyncadd (%p898_p13), %s569_s14, 4294966272  ;;  %p16_p0 = scmp.ge.s32.totalorder %s1149_s23, 5   ;;  %s1289_s9 = smov %s1065_s10 }
 0x11c   : > { %s1290_s10 = smov %s1069_s11  ;;  %s1291_s11 = smov %s1159_s28 }
 0x11d   : > { %s1292_s12 = smov %s1149_s23  ;;  %18 = sbr.rel (!%p16_p0) target bundleno = 6 (0x6), region = 77 }
 0x122   :  { %575 = vsyncpa [#allocation3], 1 }
 0x123   :  { %577 = vsyncpa [#allocation3 + $0x1], 1 }
 0x124   :  { %578 = vsyncpa [#allocation6], 1 }
 0x125   :  { %579 = vsyncpa [#allocation4], 1 }
 0x126   :  { %581 = vsyncpa [#allocation4 + $0x1], 1 }

</bundles_post_ra>
